<compile_context>
chip_gen: v6e
topology: v6e:2x2x1
jax: 0.10.0
libtpu: 0.0.40
codegen_flags: <defaults>
</compile_context>

<pallas_src>
import math
import functools

import jax
import jax.numpy as jnp
from jax.experimental import pallas as pl
from jax.experimental.pallas import tpu as pltpu

EPS = 1e-5                  # nn.LayerNorm default
NEG_INF = float("-inf")


# ----------------------- small helpers -----------------------

def _pick_tile(dim, target, align):
    """Largest tile <= target that divides dim and respects `align`; else full dim."""
    if dim <= target:
        return dim
    t = (target // align) * align
    while t >= align:
        if dim % t == 0:
            return t
        t -= align
    return dim  # fallback: single block (fine for the small demo shapes)


def _row(v, m):
    return v.reshape(1, m).astype(jnp.float32)


def _layernorm_f32(y, g, b):
    mean = jnp.mean(y, axis=-1, keepdims=True)
    var = jnp.mean(jnp.square(y - mean), axis=-1, keepdims=True)
    return (y - mean) * jax.lax.rsqrt(var + EPS) * g + b


# ----------------------- tiled matmul kernels -----------------------

def _matmul_kernel(x_ref, w_ref, b_ref, o_ref, acc_ref, *, relu):
    @pl.when(pl.program_id(2) == 0)
    def _():
        acc_ref[...] = jnp.zeros_like(acc_ref)

    acc_ref[...] += jnp.dot(x_ref[...], w_ref[...],
                            preferred_element_type=jnp.float32)

    @pl.when(pl.program_id(2) == pl.num_programs(2) - 1)
    def _():
        y = acc_ref[...] + b_ref[...]
        if relu:
            y = jnp.maximum(y, 0.0)
        o_ref[...] = y.astype(o_ref.dtype)


def matmul(x, w, b, relu=False, out_dtype=jnp.bfloat16):
    """(N,K) @ (K,M) + b, bf16 operands / f32 accumulate, tiled + pipelined."""
    N, K = x.shape
    M = w.shape[1]
    tm = _pick_tile(N, 256, 8)
    tn = _pick_tile(M, 256, 128)
    tk = _pick_tile(K, 512, 128)
    grid = (N // tm, M // tn, K // tk)
    return pl.pallas_call(
        functools.partial(_matmul_kernel, relu=relu),
        out_shape=jax.ShapeDtypeStruct((N, M), out_dtype),
        grid=grid,
        in_specs=[
            pl.BlockSpec((tm, tk), lambda i, j, k: (i, k)),
            pl.BlockSpec((tk, tn), lambda i, j, k: (k, j)),
            pl.BlockSpec((1, tn), lambda i, j, k: (0, j)),
        ],
        out_specs=pl.BlockSpec((tm, tn), lambda i, j, k: (i, j)),
        scratch_shapes=[pltpu.VMEM((tm, tn), jnp.float32)],
        compiler_params=pltpu.CompilerParams(
            dimension_semantics=("parallel", "parallel", "arbitrary")),
    )(x.astype(jnp.bfloat16), w.astype(jnp.bfloat16), _row(b, M))


def _matmul_nt_kernel(x_ref, w_ref, o_ref, acc_ref):
    @pl.when(pl.program_id(2) == 0)
    def _():
        acc_ref[...] = jnp.zeros_like(acc_ref)

    acc_ref[...] += jax.lax.dot_general(
        x_ref[...], w_ref[...], (((1,), (1,)), ((), ())),
        preferred_element_type=jnp.float32)

    @pl.when(pl.program_id(2) == pl.num_programs(2) - 1)
    def _():
        o_ref[...] = acc_ref[...].astype(o_ref.dtype)


def matmul_nt(x, w, out_dtype=jnp.float32):
    """(N,K) @ (M,K)^T via dot_general on K -- no transposed weight copy."""
    N, K = x.shape
    M = w.shape[0]
    tm = _pick_tile(N, 256, 8)
    tn = _pick_tile(M, 256, 128)
    tk = _pick_tile(K, 512, 128)
    grid = (N // tm, M // tn, K // tk)
    return pl.pallas_call(
        _matmul_nt_kernel,
        out_shape=jax.ShapeDtypeStruct((N, M), out_dtype),
        grid=grid,
        in_specs=[
            pl.BlockSpec((tm, tk), lambda i, j, k: (i, k)),
            pl.BlockSpec((tn, tk), lambda i, j, k: (j, k)),
        ],
        out_specs=pl.BlockSpec((tm, tn), lambda i, j, k: (i, j)),
        scratch_shapes=[pltpu.VMEM((tm, tn), jnp.float32)],
        compiler_params=pltpu.CompilerParams(
            dimension_semantics=("parallel", "parallel", "arbitrary")),
    )(x.astype(jnp.bfloat16), w.astype(jnp.bfloat16))


# ----------------------- fused matmul (+relu) (+residual) + LayerNorm -----------------------

def _proj_ln_kernel(x_ref, w_ref, b_ref, *rest, relu, add_res):
    if add_res:
        res_ref, g_ref, be_ref, o_ref = rest
    else:
        g_ref, be_ref, o_ref = rest
    y = jnp.dot(x_ref[...], w_ref[...], preferred_element_type=jnp.float32)
    y = y + b_ref[...]
    if relu:
        y = jnp.maximum(y, 0.0)
    if add_res:
        y = y + res_ref[...].astype(jnp.float32)
    o_ref[...] = _layernorm_f32(y, g_ref[...], be_ref[...]).astype(o_ref.dtype)


def proj_ln(x, w, b, gamma, beta, res=None, relu=False, out_dtype=jnp.bfloat16):
    """LayerNorm( [res +] [relu] (x @ w + b) ), gridded over row tiles."""
    N, K = x.shape
    M = w.shape[1]
    tm = _pick_tile(N, 256, 8)
    grid = (N // tm,)
    args = [x.astype(jnp.bfloat16), w.astype(jnp.bfloat16), _row(b, M)]
    in_specs = [
        pl.BlockSpec((tm, K), lambda i: (i, 0)),
        pl.BlockSpec((K, M), lambda i: (0, 0)),
        pl.BlockSpec((1, M), lambda i: (0, 0)),
    ]
    if res is not None:
        args.append(res.astype(jnp.bfloat16))
        in_specs.append(pl.BlockSpec((tm, M), lambda i: (i, 0)))
    args += [_row(gamma, M), _row(beta, M)]
    in_specs += [pl.BlockSpec((1, M), lambda i: (0, 0)),
                 pl.BlockSpec((1, M), lambda i: (0, 0))]
    return pl.pallas_call(
        functools.partial(_proj_ln_kernel, relu=relu, add_res=res is not None),
        out_shape=jax.ShapeDtypeStruct((N, M), out_dtype),
        grid=grid,
        in_specs=in_specs,
        out_specs=pl.BlockSpec((tm, M), lambda i: (i, 0)),
        compiler_params=pltpu.CompilerParams(dimension_semantics=("parallel",)),
    )(*args)


def _ffn_ln_kernel(x_ref, w1_ref, b1_ref, w2_ref, b2_ref, g_ref, be_ref, o_ref):
    x = x_ref[...]
    h = jnp.dot(x, w1_ref[...], preferred_element_type=jnp.float32) + b1_ref[...]
    h = jnp.maximum(h, 0.0)
    y = jnp.dot(h.astype(jnp.bfloat16), w2_ref[...],
                preferred_element_type=jnp.float32)
    y = y + b2_ref[...] + x.astype(jnp.float32)          # residual
    o_ref[...] = _layernorm_f32(y, g_ref[...], be_ref[...]).astype(o_ref.dtype)


def ffn_ln(x, w1, b1, w2, b2, gamma, beta, out_dtype=jnp.bfloat16):
    """LayerNorm( x + relu(x@w1+b1) @ w2 + b2 ), fused, gridded over row tiles."""
    N, E = x.shape
    H = w1.shape[1]
    tm = _pick_tile(N, 256, 8)
    grid = (N // tm,)
    return pl.pallas_call(
        _ffn_ln_kernel,
        out_shape=jax.ShapeDtypeStruct((N, E), out_dtype),
        grid=grid,
        in_specs=[
            pl.BlockSpec((tm, E), lambda i: (i, 0)),
            pl.BlockSpec((E, H), lambda i: (0, 0)),
            pl.BlockSpec((1, H), lambda i: (0, 0)),
            pl.BlockSpec((H, E), lambda i: (0, 0)),
            pl.BlockSpec((1, E), lambda i: (0, 0)),
            pl.BlockSpec((1, E), lambda i: (0, 0)),
            pl.BlockSpec((1, E), lambda i: (0, 0)),
        ],
        out_specs=pl.BlockSpec((tm, E), lambda i: (i, 0)),
        compiler_params=pltpu.CompilerParams(dimension_semantics=("parallel",)),
    )(x.astype(jnp.bfloat16), w1.astype(jnp.bfloat16), _row(b1, H),
      w2.astype(jnp.bfloat16), _row(b2, E), _row(gamma, E), _row(beta, E))


# ----------------------- attention kernels -----------------------

def _mha_compute(q, k, v, kbias, nhead, scale, causal):
    """q:(Tq,E) k,v:(Tk,E) bf16, kbias:(1,Tk) f32 additive. Returns (Tq,E) f32."""
    Tq, E = q.shape
    Tk = k.shape[0]
    dh = E // nhead
    if causal:
        rows = jax.lax.broadcasted_iota(jnp.int32, (Tq, Tk), 0)
        cols = jax.lax.broadcasted_iota(jnp.int32, (Tq, Tk), 1)
        causal_ok = cols <= rows
    outs = []
    for h in range(nhead):
        sl = slice(h * dh, (h + 1) * dh)
        s = jax.lax.dot_general(q[:, sl], k[:, sl], (((1,), (1,)), ((), ())),
                                preferred_element_type=jnp.float32) * scale
        s = s + kbias
        if causal:
            s = jnp.where(causal_ok, s, NEG_INF)
        m = jnp.max(s, axis=-1, keepdims=True)
        m = jnp.maximum(m, -1e30)                 # NaN guard for fully-masked rows
        p = jnp.exp(s - m)
        denom = jnp.sum(p, axis=-1, keepdims=True)
        denom = jnp.where(denom > 0.0, denom, 1.0)
        p = p * pl.reciprocal(denom, approx=True)
        outs.append(jnp.dot(p.astype(v.dtype), v[:, sl],
                            preferred_element_type=jnp.float32))
    return outs[0] if nhead == 1 else jnp.concatenate(outs, axis=-1)


def _self_attn_kernel(qkv_ref, kbias_ref, o_ref, *, nhead, scale):
    qkv = qkv_ref[0]                       # (T, 3E) bf16
    E = qkv.shape[-1] // 3
    out = _mha_compute(qkv[:, :E], qkv[:, E:2 * E], qkv[:, 2 * E:],
                       kbias_ref[0], nhead, scale, causal=True)
    o_ref[0] = out.astype(o_ref.dtype)


def _cross_attn_kernel(q_ref, kv_ref, kbias_ref, o_ref, *, nhead, scale):
    q = q_ref[0]                           # (T, E)
    kv = kv_ref[0]                         # (S, 2E)
    E = q.shape[-1]
    out = _mha_compute(q, kv[:, :E], kv[:, E:],
                       kbias_ref[0], nhead, scale, causal=False)
    o_ref[0] = out.astype(o_ref.dtype)


def self_attention(qkv, kbias, nhead):
    """qkv: (B, T, 3E) bf16, kbias: (B, 1, T) f32 additive key-padding bias."""
    B, T, E3 = qkv.shape
    E = E3 // 3
    dh = E // nhead
    return pl.pallas_call(
        functools.partial(_self_attn_kernel, nhead=nhead, scale=1.0 / math.sqrt(dh)),
        out_shape=jax.ShapeDtypeStruct((B, T, E), jnp.bfloat16),
        grid=(B,),
        in_specs=[
            pl.BlockSpec((1, T, E3), lambda b: (b, 0, 0)),
            pl.BlockSpec((1, 1, T), lambda b: (b, 0, 0)),
        ],
        out_specs=pl.BlockSpec((1, T, E), lambda b: (b, 0, 0)),
        compiler_params=pltpu.CompilerParams(dimension_semantics=("parallel",)),
    )(qkv, kbias.astype(jnp.float32))


def cross_attention(q, kv, kbias, nhead):
    """q: (B, T, E), kv: (B, S, 2E) bf16, kbias: (B, 1, S) f32 additive bias."""
    B, T, E = q.shape
    S = kv.shape[1]
    dh = E // nhead
    return pl.pallas_call(
        functools.partial(_cross_attn_kernel, nhead=nhead, scale=1.0 / math.sqrt(dh)),
        out_shape=jax.ShapeDtypeStruct((B, T, E), jnp.bfloat16),
        grid=(B,),
        in_specs=[
            pl.BlockSpec((1, T, E), lambda b: (b, 0, 0)),
            pl.BlockSpec((1, S, 2 * E), lambda b: (b, 0, 0)),
            pl.BlockSpec((1, 1, S), lambda b: (b, 0, 0)),
        ],
        out_specs=pl.BlockSpec((1, T, E), lambda b: (b, 0, 0)),
        compiler_params=pltpu.CompilerParams(dimension_semantics=("parallel",)),
    )(q, kv, kbias.astype(jnp.float32))


# ----------------------- model pieces -----------------------

def decoder_layer(x, memory, p, nhead, tgt_kbias, mem_kbias):
    """nn.TransformerDecoderLayer (post-norm, ReLU FFN, dropout = identity)."""
    B, T, E = x.shape
    S = memory.shape[1]
    N = B * T
    x2 = x.reshape(N, E)

    # --- self attention (fused QKV projection, causal mask built in-kernel) ---
    sp = p["self_attn"]
    qkv = matmul(x2, sp["wqkv"], sp["bqkv"]).reshape(B, T, 3 * E)
    a = self_attention(qkv, tgt_kbias, nhead).reshape(N, E)
    x2 = proj_ln(a, sp["wo"], sp["bo"], p["norm1_g"], p["norm1_b"], res=x2)

    # --- cross attention (fused KV projection of memory) ---
    cp = p["cross_attn"]
    q = matmul(x2, cp["wq"], cp["bq"]).reshape(B, T, E)
    kv = matmul(memory.reshape(B * S, E), cp["wkv"], cp["bkv"]).reshape(B, S, 2 * E)
    a = cross_attention(q, kv, mem_kbias, nhead).reshape(N, E)
    x2 = proj_ln(a, cp["wo"], cp["bo"], p["norm2_g"], p["norm2_b"], res=x2)

    # --- fused FFN + residual + LayerNorm ---
    x2 = ffn_ln(x2, p["w1"], p["b1"], p["w2"], p["b2"], p["norm3_g"], p["norm3_b"])
    return x2.reshape(B, T, E)


def transformer_decoder_forward(params, word, attn_emb, attn_emb_len, cap_padding_mask):
    """Mirrors TransformerDecoder.forward (dropouts as identity, batch-first layout)."""
    B, T = word.shape
    S = attn_emb.shape[1]
    A = attn_emb.shape[2]
    V, E = params["emb"].shape
    nhead = max(1, E // 64)

    # attn_proj: Linear -> ReLU -> (Dropout) -> LayerNorm, fused in one kernel
    memory = proj_ln(attn_emb.reshape(B * S, A),
                     params["attn_proj_w"], params["attn_proj_b"],
                     params["attn_proj_ln_g"], params["attn_proj_ln_b"],
                     relu=True).reshape(B, S, E)

    # word embedding gather (glue) * sqrt(E) + positional encoding
    emb = params["emb"][word].astype(jnp.float32) * math.sqrt(E)
    emb = emb + params["pe"][None, :T, :]
    x = emb.astype(jnp.bfloat16)                                     # (B, T, E)

    # key-padding additive biases only; the causal mask is generated in-kernel
    tgt_kbias = jnp.where(cap_padding_mask, NEG_INF, 0.0).astype(jnp.float32)
    tgt_kbias = tgt_kbias.reshape(B, 1, T)
    mem_valid = jnp.arange(S)[None, :] < attn_emb_len[:, None]
    mem_kbias = jnp.where(mem_valid, 0.0, NEG_INF).astype(jnp.float32)
    mem_kbias = mem_kbias.reshape(B, 1, S)

    for lp in params["layers"]:
        x = decoder_layer(x, memory, lp, nhead, tgt_kbias, mem_kbias)

    # classifier tied to embedding weight: logits = x @ emb^T (contraction on E,
    # no transposed copy of the embedding is materialized)
    logits = matmul_nt(x.reshape(B * T, E), params["emb"], out_dtype=jnp.float32)
    return logits.reshape(B, T, V)


# ----------------------- deterministic parameter init -----------------------

def init_params(key, emb_dim, vocab_size, attn_emb_dim, nlayers=2, max_len=100):
    E = emb_dim
    keys = iter(jax.random.split(key, 128))

    def xav(shape):
        bound = math.sqrt(6.0 / (shape[0] + shape[1]))
        return jax.random.uniform(next(keys), shape, jnp.float32, -bound, bound)

    params = {}
    params["emb"] = xav((vocab_size, E))                 # shared with classifier
    params["attn_proj_w"] = xav((attn_emb_dim, E))
    params["attn_proj_b"] = jnp.zeros((E,), jnp.float32)
    params["attn_proj_ln_g"] = jnp.ones((E,), jnp.float32)
    params["attn_proj_ln_b"] = jnp.zeros((E,), jnp.float32)

    # sinusoidal positional encoding
    # TODO(synk): torch's init_params() would overwrite the registered `pe`
    # Parameter with xavier noise; exact values are arbitrary, sinusoidal kept.
    position = jnp.arange(max_len, dtype=jnp.float32)[:, None]
    div_term = jnp.exp(jnp.arange(0, E, 2, dtype=jnp.float32) * (-math.log(10000.0) / E))
    pe = jnp.zeros((max_len, E), jnp.float32)
    pe = pe.at[:, 0::2].set(jnp.sin(position * div_term))
    pe = pe.at[:, 1::2].set(jnp.cos(position * div_term))
    params["pe"] = pe

    def self_attn_block():
        return {"wqkv": xav((E, 3 * E)), "bqkv": jnp.zeros((3 * E,), jnp.float32),
                "wo": xav((E, E)), "bo": jnp.zeros((E,), jnp.float32)}

    def cross_attn_block():
        return {"wq": xav((E, E)), "bq": jnp.zeros((E,), jnp.float32),
                "wkv": xav((E, 2 * E)), "bkv": jnp.zeros((2 * E,), jnp.float32),
                "wo": xav((E, E)), "bo": jnp.zeros((E,), jnp.float32)}

    layers = []
    for _ in range(nlayers):
        layers.append({
            "self_attn": self_attn_block(),
            "cross_attn": cross_attn_block(),
            "w1": xav((E, 4 * E)), "b1": jnp.zeros((4 * E,), jnp.float32),
            "w2": xav((4 * E, E)), "b2": jnp.zeros((E,), jnp.float32),
            "norm1_g": jnp.ones((E,), jnp.float32), "norm1_b": jnp.zeros((E,), jnp.float32),
            "norm2_g": jnp.ones((E,), jnp.float32), "norm2_b": jnp.zeros((E,), jnp.float32),
            "norm3_g": jnp.ones((E,), jnp.float32), "norm3_b": jnp.zeros((E,), jnp.float32),
        })
    params["layers"] = layers
    return params


# ----------------------- demo -----------------------

if __name__ == "__main__":
    emb_dim = 128           # -> nhead = 2, dim_feedforward = 512
    vocab_size = 512
    attn_emb_dim = 128
    B, T, S = 2, 8, 16

    key = jax.random.PRNGKey(0)
    kp, kw, ka = jax.random.split(key, 3)
    params = init_params(kp, emb_dim, vocab_size, attn_emb_dim)

    word = jax.random.randint(kw, (B, T), 0, vocab_size, dtype=jnp.int32)
    attn_emb = jax.random.normal(ka, (B, S, attn_emb_dim), dtype=jnp.float32)
    attn_emb_len = jnp.array([S, 11], dtype=jnp.int32)
    cap_padding_mask = jnp.array(
        [[False] * T, [False] * 5 + [True] * 3], dtype=bool)

    logits = transformer_decoder_forward(params, word, attn_emb,
                                         attn_emb_len, cap_padding_mask)
    jax.block_until_ready(logits)
    assert logits.shape == (B, T, vocab_size)
    assert bool(jnp.all(jnp.isfinite(logits)))
    print("KERNEL_OK")
</pallas_src>

<mosaic_0001>
module attributes {stable_mosaic.version = 11 : i64} {
  func.func @_proj_ln_kernel(%arg0: i32, %arg1: memref<32x128xbf16, #tpu.memory_space<vmem>>, %arg2: memref<128x128xbf16, #tpu.memory_space<vmem>>, %arg3: memref<1x128xf32, #tpu.memory_space<vmem>>, %arg4: memref<1x128xf32, #tpu.memory_space<vmem>>, %arg5: memref<1x128xf32, #tpu.memory_space<vmem>>, %arg6: memref<32x128xbf16, #tpu.memory_space<vmem>>) attributes {dimension_semantics = [#tpu.dimension_semantics<parallel>], iteration_bounds = array<i64: 1>, scalar_prefetch = 0 : i64, scratch_operands = 0 : i64, tpu.core_type = #tpu.core_type<tc>, window_params = [{transform_indices = @transform_0, window_bounds = array<i64: 32, 128>}, {pipeline_mode = #tpu.pipeline_mode<synchronous>, transform_indices = @transform_1, window_bounds = array<i64: 128, 128>}, {pipeline_mode = #tpu.pipeline_mode<synchronous>, transform_indices = @transform_2, window_bounds = array<i64: 1, 128>}, {pipeline_mode = #tpu.pipeline_mode<synchronous>, transform_indices = @transform_3, window_bounds = array<i64: 1, 128>}, {pipeline_mode = #tpu.pipeline_mode<synchronous>, transform_indices = @transform_4, window_bounds = array<i64: 1, 128>}, {transform_indices = @transform_5, window_bounds = array<i64: 32, 128>}]} {
    %c0 = arith.constant 0 : index
    %c0_0 = arith.constant 0 : index
    %0 = vector.load %arg1[%c0, %c0_0] : memref<32x128xbf16, #tpu.memory_space<vmem>>, vector<32x128xbf16>
    %c0_1 = arith.constant 0 : index
    %c0_2 = arith.constant 0 : index
    %1 = vector.load %arg2[%c0_1, %c0_2] : memref<128x128xbf16, #tpu.memory_space<vmem>>, vector<128x128xbf16>
    %cst = arith.constant dense<0.000000e+00> : vector<32x128xf32>
    %2 = tpu.matmul %0, %1, %cst {dimension_numbers = #tpu.dot_dimension_numbers<[1], [0], [0], [1], [0, 0, 1, 1], [], []>} : vector<32x128xbf16>, vector<128x128xbf16>, vector<32x128xf32> -> vector<32x128xf32>
    %c0_3 = arith.constant 0 : index
    %c0_4 = arith.constant 0 : index
    %3 = vector.load %arg3[%c0_3, %c0_4] : memref<1x128xf32, #tpu.memory_space<vmem>>, vector<1x128xf32>
    %4 = vector.broadcast %3 : vector<1x128xf32> to vector<32x128xf32>
    %5 = arith.addf %2, %4 : vector<32x128xf32>
    %cst_5 = arith.constant 0.000000e+00 : f32
    %6 = vector.broadcast %cst_5 : f32 to vector<32x128xf32>
    %7 = arith.maximumf %5, %6 : vector<32x128xf32>
    %c0_6 = arith.constant 0 : index
    %c0_7 = arith.constant 0 : index
    %8 = vector.load %arg4[%c0_6, %c0_7] : memref<1x128xf32, #tpu.memory_space<vmem>>, vector<1x128xf32>
    %c0_8 = arith.constant 0 : index
    %c0_9 = arith.constant 0 : index
    %9 = vector.load %arg5[%c0_8, %c0_9] : memref<1x128xf32, #tpu.memory_space<vmem>>, vector<1x128xf32>
    %cst_10 = arith.constant dense<0.000000e+00> : vector<32xf32>
    %10 = vector.multi_reduction <add>, %7, %cst_10 [1] : vector<32x128xf32> to vector<32xf32>
    %11 = vector.shape_cast %10 : vector<32xf32> to vector<32x1xf32>
    %cst_11 = arith.constant 1.280000e+02 : f32
    %12 = vector.broadcast %cst_11 : f32 to vector<32x1xf32>
    %13 = arith.divf %11, %12 : vector<32x1xf32>
    %14 = vector.broadcast %13 : vector<32x1xf32> to vector<32x128xf32>
    %15 = arith.subf %7, %14 : vector<32x128xf32>
    %16 = arith.mulf %15, %15 : vector<32x128xf32>
    %cst_12 = arith.constant dense<0.000000e+00> : vector<32xf32>
    %17 = vector.multi_reduction <add>, %16, %cst_12 [1] : vector<32x128xf32> to vector<32xf32>
    %18 = vector.shape_cast %17 : vector<32xf32> to vector<32x1xf32>
    %cst_13 = arith.constant 1.280000e+02 : f32
    %19 = vector.broadcast %cst_13 : f32 to vector<32x1xf32>
    %20 = arith.divf %18, %19 : vector<32x1xf32>
    %21 = vector.broadcast %13 : vector<32x1xf32> to vector<32x128xf32>
    %22 = arith.subf %7, %21 : vector<32x128xf32>
    %cst_14 = arith.constant 9.99999974E-6 : f32
    %23 = vector.broadcast %cst_14 : f32 to vector<32x1xf32>
    %24 = arith.addf %20, %23 : vector<32x1xf32>
    %25 = math.rsqrt %24 : vector<32x1xf32>
    %26 = vector.broadcast %25 : vector<32x1xf32> to vector<32x128xf32>
    %27 = arith.mulf %22, %26 : vector<32x128xf32>
    %28 = vector.broadcast %8 : vector<1x128xf32> to vector<32x128xf32>
    %29 = arith.mulf %27, %28 : vector<32x128xf32>
    %30 = vector.broadcast %9 : vector<1x128xf32> to vector<32x128xf32>
    %31 = arith.addf %29, %30 : vector<32x128xf32>
    %32 = arith.truncf %31 : vector<32x128xf32> to vector<32x128xbf16>
    %c0_15 = arith.constant 0 : index
    %c0_16 = arith.constant 0 : index
    %33 = vector.load %arg6[%c0_15, %c0_16] : memref<32x128xbf16, #tpu.memory_space<vmem>>, vector<32x128xbf16>
    tpu.vector_store %arg6[%c0_15, %c0_16], %32 {strides = array<i32>} : memref<32x128xbf16, #tpu.memory_space<vmem>>, vector<32x128xbf16>,
    return
  }
  func.func @transform_0(%arg0: i32) -> (i32, i32) {
    %c0_i32 = arith.constant 0 : i32
    %c0_i32_0 = arith.constant 0 : i32
    return %arg0, %c0_i32 : i32, i32
  }
  func.func @transform_1(%arg0: i32) -> (i32, i32) {
    %c0_i32 = arith.constant 0 : i32
    %c0_i32_0 = arith.constant 0 : i32
    %c0_i32_1 = arith.constant 0 : i32
    return %c0_i32, %c0_i32_0 : i32, i32
  }
  func.func @transform_2(%arg0: i32) -> (i32, i32) {
    %c0_i32 = arith.constant 0 : i32
    %c0_i32_0 = arith.constant 0 : i32
    %c0_i32_1 = arith.constant 0 : i32
    return %c0_i32, %c0_i32_0 : i32, i32
  }
  func.func @transform_3(%arg0: i32) -> (i32, i32) {
    %c0_i32 = arith.constant 0 : i32
    %c0_i32_0 = arith.constant 0 : i32
    %c0_i32_1 = arith.constant 0 : i32
    return %c0_i32, %c0_i32_0 : i32, i32
  }
  func.func @transform_4(%arg0: i32) -> (i32, i32) {
    %c0_i32 = arith.constant 0 : i32
    %c0_i32_0 = arith.constant 0 : i32
    %c0_i32_1 = arith.constant 0 : i32
    return %c0_i32, %c0_i32_0 : i32, i32
  }
  func.func @transform_5(%arg0: i32) -> (i32, i32) {
    %c0_i32 = arith.constant 0 : i32
    %c0_i32_0 = arith.constant 0 : i32
    return %arg0, %c0_i32 : i32, i32
  }
}

</mosaic_0001>

<bundles_post_ra>
// kernel: tpu_custom_call.1
= control target key start
LH: loop header
LB: loop body
LE: loop exit
PB: predicated region body
PF: predicated region fallthrough
CT: control target
= control target key end

     0   :  { %10 = vsyncpa [#allocation3], 0  ;;  %s508_s0 = inlined_call_operand.hbm [shape: bf16[32,128], index: 0, kind: input, shape index: {}]   ;;  %s509_s1 = inlined_call_operand.hbm [shape: bf16[128,128], index: 1, kind: input, shape index: {}]   ;;  %s510_s2 = inlined_call_operand.vmem [shape: f32[1,128], index: 2, kind: input, shape index: {}]   ;;  %s511_s3 = inlined_call_operand.vmem [shape: f32[1,128], index: 3, kind: input, shape index: {}]   ;;  %s512_s4 = inlined_call_operand.vmem [shape: f32[1,128], index: 4, kind: input, shape index: {}]   ;;  %s513_s5 = inlined_call_operand.hbm [shape: bf16[32,128], index: 5, kind: output, shape index: {}]  }
   0x1   :  { %11 = vsyncpa [#allocation6], 0 }
   0x2   :  { %12 = vsyncpa [#allocation4], 0  ;;  %s446_s18 = smov [#allocation2]  }
   0x3   :  { %s18_s19 = sshll.u32 %s446_s18, 4  ;;  %s19_s19 = int_to_ptr.vmem [resolvable:$true] %s18_s19 }
   0x4   :  { %s388_s20 = scalar_lea.vmem %s19_s19, 256  ;;  %p393_p1 = scmp.lt.s32.totalorder %s19_s19, %s19_s19 }
   0x5   :  { %p389_p0 = scmp.ne.s32.totalorder %s19_s19, %s388_s20  ;;  %p394_p2 = scmp.lt.s32.totalorder %s388_s20, %s388_s20 }
   0x7   :  { %p395_p3 = por %p394_p2, %p393_p1 }
   0x9   :  { %p396_p4 = pnand %p395_p3, %p389_p0 }
   0xb   :  { %399 = shalt.err (!%p396_p4)
}
   0xc   :  { %s447_s21 = smov 64   ;;  %s448_s22 = smov 4  }
   0xd   :  { %24 = dma.hbm_to_vmem [thread:$0]  %s508_s0, 256, %s19_s19, [#allocation3], %s447_s21, %s447_s21, %s448_s22  }
   0xe   :  { %s449_s25 = smov [#allocation5]  }
   0xf   :  { %s30_s26 = sshll.u32 %s449_s25, 4  ;;  %s31_s26 = int_to_ptr.vmem [resolvable:$true] %s30_s26 }
  0x10   :  { %s408_s27 = scalar_lea.vmem %s31_s26, 1024  ;;  %p413_p6 = scmp.lt.s32.totalorder %s31_s26, %s31_s26 }
  0x11   :  { %p409_p5 = scmp.ne.s32.totalorder %s31_s26, %s408_s27  ;;  %p414_p7 = scmp.lt.s32.totalorder %s408_s27, %s408_s27 }
  0x13   :  { %p415_p8 = por %p414_p7, %p413_p6 }
  0x15   :  { %p416_p9 = pnand %p415_p8, %p409_p5 }
  0x17   :  { %419 = shalt.err (!%p416_p9)
}
  0x18   :  { %36 = dma.hbm_to_vmem [thread:$0]  %s509_s1, 1024, %s31_s26, [#allocation6], %s447_s21, %s447_s21, %s448_s22  }
  0x19   :  { %440 = dma.done.wait [#allocation3], 256  }
  0x1a   :  { %441 = vsyncadd [#allocation3], 4294967040 }
  0x1b   :  { %442 = dma.done.wait [#allocation6], 1024  }
  0x1c   :  { %443 = vsyncadd [#allocation6], 4294966272  ;;  %v362_v0 = vld [vmem:[#allocation5 + $0x38] sm:$0xff]   ;;  %v363_v1 = vld [vmem:[#allocation5 + $0x30] sm:$0xff]   ;;  %s450_s8 = smov [#allocation7]  }
  0x1d   :  { %337 = vmatprep.subr.bf16.mxu0 %v362_v0  ;;  %v364_v2 = vld [vmem:[#allocation5 + $0x28] sm:$0xff]   ;;  %v365_v3 = vld [vmem:[#allocation5 + $0x20] sm:$0xff]   ;;  %v370_v4 = vld [vmem:[#allocation2] sm:$0xff]   ;;  %s282_s9 = sshll.u32 %s450_s8, 4  ;;  %s283_s9 = int_to_ptr.vmem [resolvable:$true] %s282_s9 }
  0x1e   :  { %338 = vmatpush3.bf16.msra.mxu0 %v362_v0  ;;  %353 = vmatprep.mubr.bf16.mxu0 %v370_v4  ;;  %v366_v5 = vld [vmem:[#allocation5 + $0x18] sm:$0xff]   ;;  %v367_v6 = vld [vmem:[#allocation5 + $0x10] sm:$0xff]   ;;  %v368_v7 = vld [vmem:[#allocation5 + $0x8] sm:$0xff]   ;;  %p425_p11 = scmp.lt.s32.totalorder %s283_s9, %s283_s9 }
  0x1f   :  { %339 = vmatprep.subr.bf16.mxu0 %v363_v1  ;;  %v369_v8 = vld [vmem:[#allocation5] sm:$0xff]   ;;  %v371_v9 = vld [vmem:[#allocation2 + $0x8] sm:$0xff]   ;;  %v295_v10 = vld [vmem:[%s510_s2] ss:$0 sm:$0xff] }
  0x20   :  { %v306_v53 = vld [vmem:[%s511_s3] ss:$0 sm:$0xff]  ;;  %s420_s3 = scalar_lea.vmem %s283_s9, 256 }
  0x21   :  { %v307_v58 = vld [vmem:[%s512_s4] ss:$0 sm:$0xff]  ;;  %p421_p10 = scmp.ne.s32.totalorder %s283_s9, %s420_s3  ;;  %p426_p12 = scmp.lt.s32.totalorder %s420_s3, %s420_s3 }
  0x22   :  { %340 = vmatpush3.bf16.msra.mxu0 %v363_v1 }
  0x23   :  { %341 = vmatprep.subr.bf16.mxu0 %v364_v2  ;;  %p427_p13 = por %p426_p12, %p425_p11 }
  0x25   :  { %p428_p0 = pnand %p427_p13, %p421_p10 }
  0x26   :  { %342 = vmatpush3.bf16.msra.mxu0 %v364_v2 }
  0x27   :  { %343 = vmatprep.subr.bf16.mxu0 %v365_v3 }
  0x2a   :  { %344 = vmatpush3.bf16.msra.mxu0 %v365_v3 }
  0x2b   :  { %345 = vmatprep.subr.bf16.mxu0 %v366_v5 }
  0x2e   :  { %346 = vmatpush3.bf16.msra.mxu0 %v366_v5 }
  0x2f   :  { %347 = vmatprep.subr.bf16.mxu0 %v367_v6 }
  0x32   :  { %348 = vmatpush3.bf16.msra.mxu0 %v367_v6 }
  0x33   :  { %349 = vmatprep.subr.bf16.mxu0 %v368_v7 }
  0x36   :  { %350 = vmatpush3.bf16.msra.mxu0 %v368_v7 }
  0x37   :  { %351 = vmatprep.subr.bf16.mxu0 %v369_v8 }
  0x3a   :  { %352 = vmatpush3.bf16.msra.mxu0 %v369_v8 }
  0x3d   :  { %354 = vmatmul.mubr.bf16.vlgmr.msra.gmra.mxu0 %v371_v9 }
  0xfd   :  { %v355_v11 = vpop.f32.mrf.mxu0 }
  0xfe   :  { %v180_v12 = vadd.f32 %v355_v11, %v295_v10 }
  0xff   :  { %v171_v13 = vpop.f32.mrf.mxu0 }
 0x100   :  { %v188_v14 = vmax.f32 %v180_v12, 0.0  ;;  %v172_v15 = vadd.f32 %v295_v10, %v171_v13 }
 0x101   :  { %v356_v16 = vpop.f32.mrf.mxu0 }
 0x102   :  { %v186_v17 = vmax.f32 %v172_v15, 0.0  ;;  %v183_v18 = vadd.f32 %v356_v16, %v295_v10  ;;  %196 = vadd.xlane.f32.xlu1 %v188_v14 }
 0x103   :  { %v174_v19 = vpop.f32.mrf.mxu0 }
 0x104   :  { %v189_v20 = vmax.f32 %v183_v18, 0.0  ;;  %v175_v21 = vadd.f32 %v295_v10, %v174_v19  ;;  %192 = vadd.xlane.f32.xlu0 %v186_v17 }
 0x106   :  { %v187_v22 = vmax.f32 %v175_v21, 0.0  ;;  %198 = vadd.xlane.f32.xlu1 %v189_v20 }
 0x108   :  { %194 = vadd.xlane.f32.xlu0 %v187_v22 }
 0x18b   :  { %v197_v23 = vpop.xlane.xlu1 %196 }
 0x18c   :  { %v203_v25 = vmul.f32 0.0078125, %v197_v23 }
 0x18d   :  { %v193_v24 = vpop.xlane.xlu0 %192 }
 0x18e   :  { %v201_v26 = vmul.f32 0.0078125, %v193_v24  ;;  %v207_v30 = vsub.f32 %v188_v14, %v203_v25 }
 0x18f   :  { %v199_v27 = vpop.xlane.xlu1 %198 }
 0x190   :  { %v205_v28 = vsub.f32 %v186_v17, %v201_v26  ;;  %v204_v31 = vmul.f32 0.0078125, %v199_v27  ;;  %v211_v36 = vmul.f32 %v207_v30, %v207_v30 }
 0x191   :  { %v195_v29 = vpop.xlane.xlu0 %194 }
 0x192   :  { %v202_v32 = vmul.f32 0.0078125, %v195_v29  ;;  %v209_v33 = vmul.f32 %v205_v28, %v205_v28  ;;  %v208_v35 = vsub.f32 %v189_v20, %v204_v31 }
 0x194   :  { %v206_v34 = vsub.f32 %v187_v22, %v202_v32  ;;  %213 = vadd.xlane.f32.xlu0 %v209_v33  ;;  %v212_v38 = vmul.f32 %v208_v35, %v208_v35 }
 0x196   :  { %v210_v37 = vmul.f32 %v206_v34, %v206_v34 }
 0x198   :  { %217 = vadd.xlane.f32.xlu0 %v211_v36  ;;  %215 = vadd.xlane.f32.xlu1 %v210_v37 }
 0x19c   :  { %219 = vadd.xlane.f32.xlu1 %v212_v38 }
 0x21d   :  { %v214_v39 = vpop.xlane.xlu0 %213 }
 0x21e   :  { %v221_v40 = vmul.f32 0.0078125, %v214_v39 }
 0x220   :  { %v225_v41 = vadd.f32 1e-05, %v221_v40 }
 0x221   :  { %v216_v42 = vpop.xlane.xlu1 %215  ;;  %v218_v43 = vpop.xlane.xlu0 %217 }
 0x222   :  { %372 = vrsqrt.f32 %v225_v41  ;;  %v222_v44 = vmul.f32 0.0078125, %v216_v42  ;;  %v223_v45 = vmul.f32 0.0078125, %v218_v43 }
 0x224   :  { %v226_v46 = vadd.f32 1e-05, %v222_v44  ;;  %v227_v47 = vadd.f32 1e-05, %v223_v45 }
 0x225   :  { %v220_v48 = vpop.xlane.xlu1 %219 }
 0x226   :  { %374 = vrsqrt.f32 %v226_v46  ;;  %v224_v49 = vmul.f32 0.0078125, %v220_v48 }
 0x227   :  { %376 = vrsqrt.f32 %v227_v47 }
 0x228   :  { %v228_v50 = vadd.f32 1e-05, %v224_v49 }
 0x22a   :  { %378 = vrsqrt.f32 %v228_v50 }
 0x22f   :  { %v373_v51 = vpop.eup %372 }
 0x230   :  { %v233_v52 = vmul.f32 %v373_v51, %v205_v28 }
 0x232   :  { %v243_v57 = vmul.f32 %v306_v53, %v233_v52 }
 0x233   :  { %v375_v54 = vpop.eup %374 }
 0x234   :  { %v377_v55 = vpop.eup %376  ;;  %v234_v56 = vmul.f32 %v375_v54, %v206_v34  ;;  %v253_v0 = vadd.f32 %v307_v58, %v243_v57 }
 0x235   :  { %v235_v59 = vmul.f32 %v377_v55, %v207_v30 }
 0x236   :  { %v244_v60 = vmul.f32 %v306_v53, %v234_v56 }
 0x237   :  { %v379_v61 = vpop.eup %378  ;;  %v245_v63 = vmul.f32 %v306_v53, %v235_v59 }
 0x238   :  { %v236_v62 = vmul.f32 %v379_v61, %v208_v35  ;;  %v254_v1 = vadd.f32 %v307_v58, %v244_v60 }
 0x239   :  { %v255_v4 = vadd.f32 %v307_v58, %v245_v63 }
 0x23a   :  { %v246_v2 = vmul.f32 %v306_v53, %v236_v62  ;;  %v319_v3 = vpack.c.bf16 %v254_v1, %v253_v0 }
 0x23c   :  { %v256_v5 = vadd.f32 %v307_v58, %v246_v2  ;;  %320 = vst [vmem:[#allocation7] sm:$0xff] %v319_v3  }
 0x23e   :  { %v324_v6 = vpack.c.bf16 %v256_v5, %v255_v4 }
 0x240   :  { %326 = vst [vmem:[#allocation7 + $0x8] sm:$0xff] %v324_v6  }
 0x241   :  { %431 = shalt.err (!%p428_p0)
}
 0x242   :  { %288 = dma.vmem_to_hbm [thread:$0]  %s283_s9, 256, %s513_s5, [#allocation4], %s447_s21, %s447_s21, %s448_s22  }
 0x243   :  { %444 = dma.done.wait [#allocation4], 256  }
 0x244   :  { %445 = vsyncadd [#allocation4], 4294967040 }
 0x245   :  { %292 = vsyncpa [#allocation3], 1 }
 0x246   :  { %293 = vsyncpa [#allocation6], 1 }
 0x247   :  { %294 = vsyncpa [#allocation4], 1 }

</bundles_post_ra>
